<compile_context>
chip_gen: v6e
topology: v6e:2x2x1
jax: 0.10.0
libtpu: 0.0.40
codegen_flags: <defaults>
</compile_context>

<pallas_src>
import jax
import jax.numpy as jnp
from jax.experimental import pallas as pl
from jax.experimental.pallas import tpu as pltpu


def _decompress_kernel(w_ref, s_ref, o_ref):
    # int8 -> scale dtype, multiply by per-row scale (lane-broadcast), cast to
    # result dtype. VPU-only work; the kernel is HBM-bandwidth-bound end to end.
    w = w_ref[...].astype(s_ref.dtype)        # (tile_o, tile_i) in scale dtype
    o_ref[...] = (w * s_ref[...]).astype(o_ref.dtype)


def _vmem_limit_bytes():
    """Generation-aware scoped-VMEM limit (leaves headroom under physical VMEM)."""
    try:
        phys = pltpu.get_tpu_info().vmem_capacity_bytes
    except Exception:
        phys = 64 << 20          # conservative fallback (v7x has the smallest VMEM)
    if phys >= (128 << 20):      # v5e / v6e: 128 MiB physical
        return 64 << 20
    if phys >= (64 << 20):       # v7x: 64 MiB physical -> stay well under
        return 44 << 20
    return 32 << 20


def _choose_tiles(O, I, out_itemsize, scale_itemsize, vmem_limit_bytes):
    """Pick (tile_o, tile_i) that fit the VMEM budget and are layout-aligned.

    Prefers full rows (tile_i == I, contiguous HBM + 1-D grid); sizes tile_o from
    the real per-block footprint (double-buffered int8 in + out_dtype out +
    lane-padded scale); splits the lane dim only as a last resort.
    """
    budget = max(vmem_limit_bytes - (4 << 20), 8 << 20)   # headroom for scratch
    per_elem = 2 * (1 + out_itemsize)                     # dbl-buffered in + out
    per_row_scale = 2 * 128 * scale_itemsize              # (tile_o,1) lane-pads to 128

    def rows_that_fit(tile_i):
        return budget // (tile_i * per_elem + per_row_scale)

    rows_full = rows_that_fit(I)
    if rows_full >= min(O, 32):
        tile_i = I                                        # full rows (preferred)
    else:
        # Extremely wide I: split lane dim (multiple of 128) so >=32 rows fit.
        tile_i = ((budget // 32 - per_row_scale) // per_elem) // 128 * 128
        tile_i = int(max(128, min(tile_i, I)))

    rows = int(rows_that_fit(tile_i))
    if O <= rows:
        tile_o = O
        # v7x has 2 TensorCores/chip: ensure the O grid has >= 2 steps so both
        # cores get work when the tensor would otherwise be a single block.
        if O >= 64:
            tile_o = ((O + 1) // 2 + 31) // 32 * 32       # multiple of 32, <= O
    else:
        tile_o = max(32, rows // 32 * 32)                 # multiple of 32
    return int(tile_o), int(tile_i)


def decompress_symmetric_int8(weight_i8, scale, result_dtype=None):
    """Pallas implementation of decompress_symmetric + result_dtype cast.

    weight_i8: int8 [O, I]
    scale:     float [O, 1]
    returns:   result_dtype [O, I]  (result_dtype=None -> scale.dtype)

    Note: prefer result_dtype=bf16 when the consumer is a bf16 matmul — f32
    writeback is 5 B/elem of HBM traffic vs 3 B/elem for bf16 on this
    bandwidth-bound op.
    """
    O, I = weight_i8.shape
    assert scale.shape == (O, 1), scale.shape
    scale_dtype = jnp.dtype(scale.dtype)
    out_dtype = scale_dtype if result_dtype is None else jnp.dtype(result_dtype)

    vmem_limit = _vmem_limit_bytes()
    tile_o, tile_i = _choose_tiles(
        O, I, out_dtype.itemsize, scale_dtype.itemsize, vmem_limit
    )

    grid_o = pl.cdiv(O, tile_o)
    grid_i = pl.cdiv(I, tile_i)

    cost = pl.CostEstimate(
        flops=O * I,
        transcendentals=0,
        bytes_accessed=O * I * (1 + out_dtype.itemsize) + O * scale_dtype.itemsize,
    )

    if grid_i == 1:
        # Full-row blocks: 1-D grid along O; each block is one contiguous HBM range.
        grid = (grid_o,)
        in_specs = [
            pl.BlockSpec((tile_o, tile_i), lambda i: (i, 0)),   # weight rows
            pl.BlockSpec((tile_o, 1), lambda i: (i, 0)),        # per-row scale
        ]
        out_specs = pl.BlockSpec((tile_o, tile_i), lambda i: (i, 0))
        dims = ("parallel",)
    else:
        grid = (grid_o, grid_i)
        in_specs = [
            pl.BlockSpec((tile_o, tile_i), lambda i, j: (i, j)),
            pl.BlockSpec((tile_o, 1), lambda i, j: (i, 0)),
        ]
        out_specs = pl.BlockSpec((tile_o, tile_i), lambda i, j: (i, j))
        dims = ("parallel", "parallel")

    # TODO(synk): on v7x, experiment with pltpu.CORE_PARALLEL on the O axis (plain
    # "parallel"/"arbitrary" is a measured codegen no-op); kept plain "parallel"
    # here so the same build runs cleanly on v5e/v6e/v7x.
    return pl.pallas_call(
        _decompress_kernel,
        out_shape=jax.ShapeDtypeStruct((O, I), out_dtype),
        grid_spec=pltpu.PrefetchScalarGridSpec(
            num_scalar_prefetch=0,
            grid=grid,
            in_specs=in_specs,
            out_specs=out_specs,
        ),
        compiler_params=pltpu.CompilerParams(
            dimension_semantics=dims,
            vmem_limit_bytes=vmem_limit,
        ),
        cost_estimate=cost,
    )(weight_i8, scale)


class INT8SymmetricWeightsDecompressor:
    """Thin JAX/Pallas mirror of the PyTorch module (functional: returns result)."""

    def __init__(self, scale, result_dtype=None):
        self.scale = scale
        self.result_dtype = result_dtype

    @property
    def num_bits(self):
        return 8

    @property
    def quantization_mode(self):
        return "symmetric"

    def pack_weight(self, weight):
        w = jnp.asarray(weight)
        # Note: this host-syncs; it is an offline packing step, not the hot path.
        if bool(jnp.any((w < -128) | (w > 127))):
            raise ValueError("Weight values are not in [-128, 127].")
        return w.astype(jnp.int8)

    def __call__(self, weight_i8):
        # Equivalent to forward(..., return_decompressed_only=True).
        # TODO(synk): the in-place `x.weight = result` mutation (the non-
        # return_decompressed_only branch) has no JAX analogue.
        return decompress_symmetric_int8(weight_i8, self.scale, self.result_dtype)


if __name__ == "__main__":
    key = jax.random.PRNGKey(0)
    k_w, k_s = jax.random.split(key)

    # Small linear-layer weight: [out_features, in_features].
    # O=64 exercises the two-TensorCore O-split (tile_o halving) + full-row 1-D grid.
    O, I = 64, 256
    weight_i8 = jax.random.randint(
        k_w, (O, I), minval=-128, maxval=128, dtype=jnp.int32
    ).astype(jnp.int8)
    scale = jax.random.uniform(k_s, (O, 1), dtype=jnp.float32) * 0.05 + 0.001

    decomp = INT8SymmetricWeightsDecompressor(scale, result_dtype=jnp.bfloat16)
    packed = decomp.pack_weight(weight_i8)
    out = jax.block_until_ready(decomp(packed))

    # Reference check (plain JAX, same math as the PyTorch module).
    ref = (weight_i8.astype(jnp.float32) * scale).astype(jnp.bfloat16)
    assert out.shape == (O, I) and out.dtype == jnp.bfloat16
    assert jnp.array_equal(out.astype(jnp.float32), ref.astype(jnp.float32))

    # Default result_dtype (= scale dtype, float32) + ragged O (tail block masked).
    O2, I2 = 72, 128
    w2 = jax.random.randint(k_w, (O2, I2), -128, 128, jnp.int32).astype(jnp.int8)
    s2 = jax.random.uniform(k_s, (O2, 1), dtype=jnp.float32) * 0.02 + 0.001
    out2 = jax.block_until_ready(decompress_symmetric_int8(w2, s2))
    assert out2.dtype == jnp.float32
    assert jnp.array_equal(out2, w2.astype(jnp.float32) * s2)

    # Ragged I (not a multiple of 128): full-extent rows, single-block grid.
    O3, I3 = 40, 200
    w3 = jax.random.randint(k_w, (O3, I3), -128, 128, jnp.int32).astype(jnp.int8)
    s3 = jax.random.uniform(k_s, (O3, 1), dtype=jnp.float32) * 0.03 + 0.001
    out3 = jax.block_until_ready(
        decompress_symmetric_int8(w3, s3, result_dtype=jnp.bfloat16)
    )
    ref3 = (w3.astype(jnp.float32) * s3).astype(jnp.bfloat16)
    assert jnp.array_equal(out3.astype(jnp.float32), ref3.astype(jnp.float32))

    print("KERNEL_OK")
</pallas_src>

<mosaic_0001>
module attributes {stable_mosaic.version = 11 : i64} {
  func.func @_decompress_kernel(%arg0: i32, %arg1: memref<32x256xi8, #tpu.memory_space<vmem>>, %arg2: memref<32x1xf32, #tpu.memory_space<vmem>>, %arg3: memref<32x256xbf16, #tpu.memory_space<vmem>>) attributes {dimension_semantics = [#tpu.dimension_semantics<parallel>], iteration_bounds = array<i64: 2>, scalar_prefetch = 0 : i64, scratch_operands = 0 : i64, tpu.core_type = #tpu.core_type<tc>, window_params = [{transform_indices = @transform_0, window_bounds = array<i64: 32, 256>}, {transform_indices = @transform_1, window_bounds = array<i64: 32, 1>}, {transform_indices = @transform_2, window_bounds = array<i64: 32, 256>}]} {
    %c0 = arith.constant 0 : index
    %c0_0 = arith.constant 0 : index
    %0 = vector.load %arg1[%c0, %c0_0] : memref<32x256xi8, #tpu.memory_space<vmem>>, vector<32x256xi8>
    %1 = arith.sitofp %0 : vector<32x256xi8> to vector<32x256xf32>
    %c0_1 = arith.constant 0 : index
    %c0_2 = arith.constant 0 : index
    %2 = vector.load %arg2[%c0_1, %c0_2] : memref<32x1xf32, #tpu.memory_space<vmem>>, vector<32x1xf32>
    %3 = vector.broadcast %2 : vector<32x1xf32> to vector<32x256xf32>
    %4 = arith.mulf %1, %3 : vector<32x256xf32>
    %5 = arith.truncf %4 : vector<32x256xf32> to vector<32x256xbf16>
    %c0_3 = arith.constant 0 : index
    %c0_4 = arith.constant 0 : index
    %6 = vector.load %arg3[%c0_3, %c0_4] : memref<32x256xbf16, #tpu.memory_space<vmem>>, vector<32x256xbf16>
    tpu.vector_store %arg3[%c0_3, %c0_4], %5 {strides = array<i32>} : memref<32x256xbf16, #tpu.memory_space<vmem>>, vector<32x256xbf16>,
    return
  }
  func.func @transform_0(%arg0: i32) -> (i32, i32) {
    %c0_i32 = arith.constant 0 : i32
    %c0_i32_0 = arith.constant 0 : i32
    return %arg0, %c0_i32 : i32, i32
  }
  func.func @transform_1(%arg0: i32) -> (i32, i32) {
    %c0_i32 = arith.constant 0 : i32
    %c0_i32_0 = arith.constant 0 : i32
    return %arg0, %c0_i32 : i32, i32
  }
  func.func @transform_2(%arg0: i32) -> (i32, i32) {
    %c0_i32 = arith.constant 0 : i32
    %c0_i32_0 = arith.constant 0 : i32
    return %arg0, %c0_i32 : i32, i32
  }
}

</mosaic_0001>

<bundles_post_ra>
// kernel: tpu_custom_call.1
= control target key start
LH: loop header
LB: loop body
LE: loop exit
PB: predicated region body
PF: predicated region fallthrough
CT: control target
= control target key end

     0   :  { %7 = vsyncpa [#allocation3], 0  ;;  %s593_s0 = inlined_call_operand.vmem [shape: s8[64,256], index: 0, kind: input, shape index: {}]   ;;  %s594_s1 = inlined_call_operand.vmem [shape: f32[64,1], index: 1, kind: input, shape index: {}]   ;;  %s595_s2 = inlined_call_operand.hbm [shape: bf16[64,256], index: 2, kind: output, shape index: {}]  }
   0x1   :  { %9 = vsyncpa [#allocation3 + $0x1], 0  ;;  %s483_s9 = smov 0   ;;  %s485_s10 = smov 0  }
   0x2   :  { %s487_s11 = smov 0   ;;  %s489_s12 = smov 0  }
   0x3 LB: > { %s504_s13 = sadd.s32 4294967295, %s462_s12   ;;  %s332_s14 = sadd.s32 4294967294, %s462_s12   ;;  %s462_s12 = sphi %s489_s12, %s601_s12   ;;  %s458_s11 = sphi %s487_s11, %s600_s11   ;;  %s454_s10 = sphi %s485_s10, %s599_s10   ;;  %s450_s9 = sphi %s483_s9, %s598_s9  }
   0x4   : > { %s508_s15 = sadd.s32 1, %s462_s12   ;;  %s74_s16 = sadd.s32 1, %s458_s11 }
   0x5   : > { %s71_s17 = ssub.s32 %s462_s12, %s508_s15  ;;  %p84_p0 = scmp.ne.s32.totalorder %s458_s11, %s454_s10 }
   0x6   : > { %p72_p1 = scmp.eq.s32.totalorder %s71_s17, 0  ;;  %p85_p2 = scmp.eq.s32.totalorder %s504_s13, 1 }
   0x7   : > { %p90_p3 = scmp.ne.s32.totalorder %s454_s10, %s450_s9  ;;  %p91_p4 = scmp.eq.s32.totalorder %s332_s14, 1 }
   0x8   : > { %s519_s18 = scalar_select %p72_p1, %s458_s11, %s74_s16  }
   0x9   : > { %p521_p5 = por %p85_p2, %p84_p0  ;;  %p525_p6 = por %p91_p4, %p90_p3 }
   0xa   : > { %p335_p7 = scmp.ge.s32.totalorder %s462_s12, 1  ;;  %p126_p8 = scmp.lt.s32.totalorder %s462_s12, 3 }
   0xc   : > { %p127_p9 = pnand %p335_p7, %p126_p8 }
   0xd   : > { %s339_s21 = sshll.u32 (!%p127_p9), %s504_s13, 2  ;;  %p153_p11 = scmp.lt.s32.totalorder (!%p127_p9), %s504_s13, 1 }
   0xe   : > { %130 = sbr.rel (%p127_p9) target bundleno = 170 (0xaa), region = 28  ;;  %p159_p10 = scmp.lt.s32.totalorder (!%p127_p9), %s339_s21, 7 }
   0xf   : > { %s150_s3 = sand.u32 (!%p127_p9), 1, %s454_s10   ;;  %s357_s7 = sshll.u32 (!%p127_p9), %s504_s13, 9 }
  0x10   : > { %s336_s4 = sshll.u32 (!%p127_p9), %s150_s3, 5  ;;  %s549_s16 = scalar_lea.hbm (!%p127_p9), %s595_s2, %s357_s7 }
  0x11   : > { %s152_s5 = scalar_lea.vmem (!%p127_p9), [#allocation2], %s336_s4 }
  0x12   : > { %s258_s6 = sshll.u32 (!%p127_p9), %s152_s5, 4  ;;  %s544_s6 = int_to_ptr.vmem [resolvable:$true] %s258_s6 }
  0x13   : > { %v464_v0 = vmov 0   ;;  %s603_s21 = smov (!%p159_p10, %s339_s21), 7  ;;  %s402_s17 = scalar_lea.vmem %s544_s6, 512 }
  0x14   : > { %401 = vset.pattern.permute.xlu1 %v464_v0  ;;  %400 = vset.pattern.permute.xlu0 %v464_v0  ;;  %s340_s22 = sshll.u32 %s603_s21, 3  ;;  %p403_p12 = scmp.ne.s32.totalorder %s544_s6, %s402_s17 }
  0x15   : > { %s162_s25 = scalar_lea.vmem %s594_s1, %s340_s22  ;;  %s465_s21 = smov [#allocation2]  }
  0x16   : > { %v185_v1 = vld [vmem:[%s162_s25 + $0x10] sm:$0xff]  ;;  %v183_v2 = vld [vmem:[%s162_s25] sm:$0xff]  ;;  %v186_v3 = vld [vmem:[%s162_s25 + $0x18] sm:$0xff]  ;;  %s154_s26 = scalar_select %p153_p11, %s504_s13, 1 }
  0x17   : > { %199 = vperm.xlu1 %401, %v185_v1   ;;  %189 = vperm.xlu0 %400, %v183_v2   ;;  %v184_v4 = vld [vmem:[%s162_s25 + $0x8] sm:$0xff]  ;;  %s553_s13 = scalar_lea.sflag [#allocation3], %s150_s3  ;;  %p404_p13 = pnand %p403_p12, %p521_p5 }
  0x18   : > { %s351_s27 = sshll.u32 %s154_s26, 4  ;;  %s406_s22 = sshll.u32 %s465_s21, 4  ;;  %s407_s22 = int_to_ptr.vmem [resolvable:$false] %s406_s22 }
  0x19   : > { %s157_s30 = scalar_lea.vmem %s593_s0, %s351_s27  ;;  %p405_p0 = pneg %p404_p13 }
  0x1a   : > { %v165_v5 = vld [vmem:[%s157_s30] sm:$0xff]  ;;  %v166_v6 = vld [vmem:[%s157_s30 + $0x8] sm:$0xff]  ;;  %s408_s23 = scalar_lea.vmem %s407_s22, 1024  ;;  %p409_p1 = scmp.lt.s32.totalorder %s544_s6, %s407_s22 }
  0x1b   : > { %204 = vperm.xlu1 %401, %v186_v3   ;;  %194 = vperm.xlu0 %400, %v184_v4   ;;  %v171_v7 = vunpack.c.2.s8 %v165_v5  ;;  %v172_v8 = vunpack.c.2.s8 %v166_v6  ;;  %v167_v9 = vunpack.c.0.s8 %v165_v5  ;;  %v168_v10 = vunpack.c.0.s8 %v166_v6  ;;  %p410_p2 = scmp.lt.s32.totalorder %s408_s23, %s402_s17 }
  0x1c   : > { %v173_v11 = vunpack.c.3.s8 %v165_v5  ;;  %v174_v12 = vunpack.c.3.s8 %v166_v6  ;;  %v169_v13 = vunpack.c.1.s8 %v165_v5  ;;  %v170_v14 = vunpack.c.1.s8 %v166_v6 }
  0x1d   : > { %v179_v15 = vcvt.s32.f32 %v171_v7  ;;  %v180_v16 = vcvt.s32.f32 %v172_v8  ;;  %v175_v17 = vcvt.s32.f32 %v167_v9  ;;  %v176_v18 = vcvt.s32.f32 %v168_v10  ;;  %p411_p3 = por %p410_p2, %p409_p1 }
  0x1e   : > { %v181_v21 = vcvt.s32.f32 %v173_v11  ;;  %v182_v22 = vcvt.s32.f32 %v174_v12  ;;  %v177_v23 = vcvt.s32.f32 %v169_v13  ;;  %v178_v24 = vcvt.s32.f32 %v170_v14 }
  0x1f   : > { %p412_p4 = pnand %p411_p3, %p405_p0 }
  0x92   : > { %v200_v19 = vpop.permute.xlu1 %199  ;;  %v190_v20 = vpop.permute.xlu0 %189 }
  0x93   : > { %v211_v25 = vmul.f32 %v200_v19, %v179_v15  ;;  %v212_v26 = vmul.f32 %v200_v19, %v180_v16  ;;  %v207_v27 = vmul.f32 %v190_v20, %v175_v17  ;;  %v208_v28 = vmul.f32 %v190_v20, %v176_v18 }
  0x95   : > { %v354_v29 = vpack.c.bf16 %v212_v26, %v211_v25  ;;  %v352_v30 = vpack.c.bf16 %v208_v28, %v207_v27 }
  0x96   : > { %v205_v31 = vpop.permute.xlu1 %204  ;;  %v195_v32 = vpop.permute.xlu0 %194 }
  0x97   : > { %241 = vst [vmem:[%s152_s5 + $0x10] sm:$0xff] %v354_v29  ;;  %239 = vst [vmem:[%s152_s5] sm:$0xff] %v352_v30  ;;  %v213_v33 = vmul.f32 %v205_v31, %v181_v21  ;;  %v214_v34 = vmul.f32 %v205_v31, %v182_v22  ;;  %v209_v35 = vmul.f32 %v195_v32, %v177_v23 }
  0x98   : > { %v210_v36 = vmul.f32 %v195_v32, %v178_v24 }
  0x99   : > { %v355_v37 = vpack.c.bf16 %v214_v34, %v213_v33 }
  0x9a   : > { %v353_v38 = vpack.c.bf16 %v210_v36, %v209_v35 }
  0x9b   : > { %242 = vst [vmem:[%s152_s5 + $0x18] sm:$0xff] %v355_v37 }
  0x9c   : > { %240 = vst [vmem:[%s152_s5 + $0x8] sm:$0xff] %v353_v38 }
  0x9d   : > { %415 = shalt.err (!%p412_p4)
}
  0x9e   : > { %s416_s24 = scalar_lea.hbm %s549_s16, 512  ;;  %s420_s27 = scalar_lea.hbm %s595_s2, 1024 }
  0x9f   : > { %p417_p7 = scmp.ne.s32.totalorder %s549_s16, %s416_s24  ;;  %p421_p10 = scmp.lt.s32.totalorder %s549_s16, %s595_s2 }
  0xa0   : > { %p422_p11 = scmp.lt.s32.totalorder %s420_s27, %s416_s24 }
  0xa1   : > { %p418_p8 = pnand %p417_p7, %p521_p5 }
  0xa2   : > { %p423_p12 = por %p422_p11, %p421_p10 }
  0xa3   : > { %p419_p9 = pneg %p418_p8 }
  0xa5   : > { %p424_p13 = pnand %p423_p12, %p419_p9 }
  0xa7   : > { %427 = shalt.err (!%p424_p13)
}
  0xa8   : > { %s466_s30 = smov 128   ;;  %s467_s3 = smov 8  }
  0xa9   : > { %358 = dma.vmem_to_hbm [thread:$0]  (%p521_p5), %s544_s6, 512, %s549_s16, %s553_s13, %s466_s30, %s466_s30, %s467_s3  }
  0xaa PF: > { %p364_p0 = scmp.ge.s32.totalorder %s462_s12, 2  ;;  %s273_s4 = sand.u32 1, %s450_s9  }
  0xab   : > { %s274_s5 = scalar_lea.sflag [#allocation3], %s273_s4 }
  0xac   : > { %p361_p1 = pnand %p364_p0, %p525_p6 }
  0xae   : > { %p362_p2 = pneg %p361_p1 }
  0xb0   : > { %445 = dma.done.wait (%p362_p2), %s274_s5, 512  }
  0xb1   : > { %447 = vsyncadd (%p362_p2), %s274_s5, 4294966784  ;;  %p12_p3 = scmp.ge.s32.totalorder %s508_s15, 4   ;;  %s598_s9 = smov %s454_s10 }
  0xb2   : > { %s599_s10 = smov %s458_s11  ;;  %s600_s11 = smov %s519_s18 }
  0xb3   : > { %s601_s12 = smov %s508_s15  ;;  %14 = sbr.rel (!%p12_p3) target bundleno = 3 (0x3), region = 66 }
  0xb8   :  { %279 = vsyncpa [#allocation3], 1 }
  0xb9   :  { %281 = vsyncpa [#allocation3 + $0x1], 1 }

</bundles_post_ra>
